<compile_context>
chip_gen: v6e
topology: v6e:2x2x1
jax: 0.10.0
libtpu: 0.0.40
codegen_flags: <defaults>
</compile_context>

<pallas_src>
import jax
import jax.numpy as jnp
from jax.experimental import pallas as pl
from jax.experimental.pallas import tpu as pltpu

LANE = 128  # lane-dense output width (all 5 heads packed + zero padding)


def _round_up(x, m):
    return (x + m - 1) // m * m


def policy_kernel(idx_ref, tab_ref, heads_ref, out_ref):
    """Fused PromptPolicyNetwork forward for one batch tile.

    idx_ref   : (BT, 2) int32 -- col 0 = concept row, col 1 = style row (pre-offset by Nc)
    tab_ref   : (R, HP) f32   -- rows: [concept_table@w1_c + b1 ; style_table@w1_s ; pad]
                                 col H is a bias-carry column (1 on concept rows only)
    heads_ref : (HP, 128) f32 -- rows 0:H fused head weights, row H fused head biases,
                                 remaining rows / lanes zero
    out_ref   : (BT, 128) f32 -- all five head logits packed lane-dense
    """
    BT = idx_ref.shape[0]
    R = tab_ref.shape[0]

    cid = idx_ref[:, 0:1]                 # (BT, 1) concept row index
    sid = idx_ref[:, 1:2]                 # (BT, 1) style row index (already offset by Nc)

    # Two-hot row selector on the VPU: 2 compares + 1 or + cast.
    # NOTE: out-of-range indices silently select nothing (PyTorch embedding would raise).
    col = jax.lax.broadcasted_iota(jnp.int32, (BT, R), 1)
    hot = ((col == cid) | (col == sid)).astype(jnp.float32)

    # Embedding gather + concat + fc1 + b1 folded into one MXU matmul; ReLU on VPU.
    # The bias-carry column gives h[:, H] == relu(1) == 1.
    h = jnp.maximum(
        jnp.dot(hot, tab_ref[...], preferred_element_type=jnp.float32), 0.0)

    # All five heads + their biases in one lane-dense MXU matmul
    # (bias-carry column of h multiplies the bias row of the heads slab).
    out_ref[...] = jnp.dot(h, heads_ref[...], preferred_element_type=jnp.float32)


def prepare_policy_params(params):
    """One-time parameter folding.  Call once per parameter set, NOT per forward."""
    hi = jax.lax.Precision.HIGHEST
    E = params["concept_table"].shape[1]
    H = params["w1"].shape[1]
    Nc = params["concept_table"].shape[0]
    Ns = params["style_table"].shape[0]

    head_names = ("role", "strategy", "format", "memory", "tone")
    head_sizes = tuple(params[f"w_{n}"].shape[1] for n in head_names)
    T = sum(head_sizes)
    assert T <= LANE, "fused head width must fit in one 128-lane tile"

    R = _round_up(Nc + Ns, 8)        # concept rows + style rows, sublane-padded
    HP = _round_up(H + 1, 8)         # hidden + bias-carry column, sublane-padded

    # fc1 folded through the embedding tables; b1 folded into the concept rows.
    ct_w1 = jnp.dot(params["concept_table"], params["w1"][:E], precision=hi) + params["b1"]
    st_w1 = jnp.dot(params["style_table"], params["w1"][E:], precision=hi)

    tab = jnp.zeros((R, HP), jnp.float32)
    tab = tab.at[:Nc, :H].set(ct_w1)
    tab = tab.at[Nc:Nc + Ns, :H].set(st_w1)
    tab = tab.at[:Nc, H].set(1.0)    # bias-carry -> h[:, H] == 1 after first matmul

    w_heads = jnp.concatenate([params[f"w_{n}"] for n in head_names], axis=1)  # (H, T)
    b_heads = jnp.concatenate([params[f"b_{n}"] for n in head_names], axis=1)  # (1, T)
    heads = jnp.zeros((HP, LANE), jnp.float32)
    heads = heads.at[:H, :T].set(w_heads)
    heads = heads.at[H, :T].set(b_heads[0])

    tab, heads = jax.block_until_ready((tab, heads))  # materialize the folding now
    return {"tab": tab, "heads": heads, "num_concepts": Nc,
            "num_styles": Ns, "head_sizes": head_sizes}


def prompt_policy_forward(concept_idx, style_idx, prepared, *, batch_tile=256):
    """Per-call forward.  Only builds the packed index array and launches the kernel."""
    tab = prepared["tab"]
    heads = prepared["heads"]
    Nc = prepared["num_concepts"]
    head_sizes = prepared["head_sizes"]

    B = concept_idx.shape[0]
    R, HP = tab.shape

    # B tile: multiple of 8; 256 rows (MXU-width on v6e/v7x) once B is large.
    BT = batch_tile if B >= batch_tile else _round_up(B, 8)
    B_pad = _round_up(B, BT)

    idx = jnp.stack(
        [concept_idx.astype(jnp.int32), style_idx.astype(jnp.int32) + Nc], axis=1)
    if B_pad != B:
        # Padded rows select row 0 twice (harmless) and are sliced off below.
        idx = jnp.pad(idx, ((0, B_pad - B), (0, 0)))

    out = pl.pallas_call(
        policy_kernel,
        out_shape=jax.ShapeDtypeStruct((B_pad, LANE), jnp.float32),
        grid=(B_pad // BT,),
        in_specs=[
            pl.BlockSpec((BT, 2), lambda i: (i, 0)),      # batch-tiled indices
            pl.BlockSpec((R, HP), lambda i: (0, 0)),      # VMEM-resident fc1 slab
            pl.BlockSpec((HP, LANE), lambda i: (0, 0)),   # VMEM-resident heads slab
        ],
        out_specs=pl.BlockSpec((BT, LANE), lambda i: (i, 0)),
        compiler_params=pltpu.CompilerParams(
            dimension_semantics=("parallel",)),           # megacore on v7x; harmless elsewhere
    )(idx, tab, heads)

    # Slice the lane-dense output into the five logit arrays outside the kernel.
    logits = []
    off = 0
    for sz in head_sizes:
        logits.append(out[:B, off:off + sz])
        off += sz
    return tuple(logits)


def make_params(key, num_concepts, num_styles, num_roles, num_strategies,
                num_formats, num_memory_modes, num_tone_styles,
                embedding_dim=16, hidden_dim=32):
    ks = jax.random.split(key, 14)

    def lin(kw, kb, fan_in, fan_out):
        bound = 1.0 / jnp.sqrt(fan_in)
        w = jax.random.uniform(kw, (fan_in, fan_out), jnp.float32, -bound, bound)
        b = jax.random.uniform(kb, (1, fan_out), jnp.float32, -bound, bound)
        return w, b

    params = {}
    params["concept_table"] = jax.random.normal(ks[0], (num_concepts, embedding_dim), jnp.float32)
    params["style_table"] = jax.random.normal(ks[1], (num_styles, embedding_dim), jnp.float32)
    params["w1"], params["b1"] = lin(ks[2], ks[3], embedding_dim * 2, hidden_dim)
    params["w_role"], params["b_role"] = lin(ks[4], ks[5], hidden_dim, num_roles)
    params["w_strategy"], params["b_strategy"] = lin(ks[6], ks[7], hidden_dim, num_strategies)
    params["w_format"], params["b_format"] = lin(ks[8], ks[9], hidden_dim, num_formats)
    params["w_memory"], params["b_memory"] = lin(ks[10], ks[11], hidden_dim, num_memory_modes)
    params["w_tone"], params["b_tone"] = lin(ks[12], ks[13], hidden_dim, num_tone_styles)
    return params


def reference_forward(concept_idx, style_idx, params):
    c_emb = params["concept_table"][concept_idx]
    s_emb = params["style_table"][style_idx]
    x = jnp.concatenate([c_emb, s_emb], axis=-1)
    h = jnp.maximum(x @ params["w1"] + params["b1"], 0.0)
    return (h @ params["w_role"] + params["b_role"],
            h @ params["w_strategy"] + params["b_strategy"],
            h @ params["w_format"] + params["b_format"],
            h @ params["w_memory"] + params["b_memory"],
            h @ params["w_tone"] + params["b_tone"])


if __name__ == "__main__":
    # Full-precision f32 matmuls outside the kernel so the folded-parameter path
    # matches the straightforward reference numerically.
    jax.config.update("jax_default_matmul_precision", "highest")

    num_concepts, num_styles = 10, 6
    num_roles, num_strategies, num_formats = 5, 4, 3
    num_memory_modes, num_tone_styles = 2, 4
    embedding_dim, hidden_dim = 16, 32
    B = 8

    key = jax.random.PRNGKey(0)
    kp, kc, ks = jax.random.split(key, 3)
    params = make_params(kp, num_concepts, num_styles, num_roles, num_strategies,
                         num_formats, num_memory_modes, num_tone_styles,
                         embedding_dim, hidden_dim)

    concept_idx = jax.random.randint(kc, (B,), 0, num_concepts, dtype=jnp.int32)
    style_idx = jax.random.randint(ks, (B,), 0, num_styles, dtype=jnp.int32)

    # One-time parameter folding (hoisted out of the per-call forward).
    prepared = prepare_policy_params(params)

    outs = prompt_policy_forward(concept_idx, style_idx, prepared)
    outs = jax.block_until_ready(outs)

    refs = reference_forward(concept_idx, style_idx, params)
    for o, r in zip(outs, refs):
        assert o.shape == r.shape and o.dtype == r.dtype
        assert jnp.allclose(o, r, atol=1e-4, rtol=1e-4)

    print("KERNEL_OK")
</pallas_src>

<mosaic_0001>
module attributes {stable_mosaic.version = 11 : i64} {
  func.func @policy_kernel(%arg0: i32, %arg1: memref<8x2xi32, #tpu.memory_space<vmem>>, %arg2: memref<16x40xf32, #tpu.memory_space<vmem>>, %arg3: memref<40x128xf32, #tpu.memory_space<vmem>>, %arg4: memref<8x128xf32, #tpu.memory_space<vmem>>) attributes {dimension_semantics = [#tpu.dimension_semantics<parallel>], iteration_bounds = array<i64: 1>, scalar_prefetch = 0 : i64, scratch_operands = 0 : i64, tpu.core_type = #tpu.core_type<tc>, window_params = [{transform_indices = @transform_0, window_bounds = array<i64: 8, 2>}, {pipeline_mode = #tpu.pipeline_mode<synchronous>, transform_indices = @transform_1, window_bounds = array<i64: 16, 40>}, {pipeline_mode = #tpu.pipeline_mode<synchronous>, transform_indices = @transform_2, window_bounds = array<i64: 40, 128>}, {transform_indices = @transform_3, window_bounds = array<i64: 8, 128>}]} {
    %c0 = arith.constant 0 : index
    %c0_0 = arith.constant 0 : index
    %0 = vector.load %arg1[%c0, %c0_0] : memref<8x2xi32, #tpu.memory_space<vmem>>, vector<8x1xi32>
    %c0_1 = arith.constant 0 : index
    %c1 = arith.constant 1 : index
    %1 = vector.load %arg1[%c0_1, %c1] : memref<8x2xi32, #tpu.memory_space<vmem>>, vector<8x1xi32>
    %2 = tpu.iota {dimensions = array<i32: 1>} : vector<8x16xi32>
    %3 = vector.broadcast %0 : vector<8x1xi32> to vector<8x16xi32>
    %4 = arith.cmpi eq, %2, %3 : vector<8x16xi32>
    %5 = vector.broadcast %1 : vector<8x1xi32> to vector<8x16xi32>
    %6 = arith.cmpi eq, %2, %5 : vector<8x16xi32>
    %7 = arith.ori %4, %6 : vector<8x16xi1>
    %8 = arith.extui %7 : vector<8x16xi1> to vector<8x16xi32>
    %9 = arith.sitofp %8 : vector<8x16xi32> to vector<8x16xf32>
    %c0_2 = arith.constant 0 : index
    %c0_3 = arith.constant 0 : index
    %10 = vector.load %arg2[%c0_2, %c0_3] : memref<16x40xf32, #tpu.memory_space<vmem>>, vector<16x40xf32>
    %cst = arith.constant dense<0.000000e+00> : vector<8x40xf32>
    %11 = tpu.matmul %9, %10, %cst {dimension_numbers = #tpu.dot_dimension_numbers<[1], [0], [0], [1], [0, 0, 1, 1], [], []>, precision = #tpu.contract_precision<fp32>} : vector<8x16xf32>, vector<16x40xf32>, vector<8x40xf32> -> vector<8x40xf32>
    %cst_4 = arith.constant 0.000000e+00 : f32
    %12 = vector.broadcast %cst_4 : f32 to vector<8x40xf32>
    %13 = arith.maximumf %11, %12 : vector<8x40xf32>
    %c0_5 = arith.constant 0 : index
    %c0_6 = arith.constant 0 : index
    %14 = vector.load %arg3[%c0_5, %c0_6] : memref<40x128xf32, #tpu.memory_space<vmem>>, vector<40x128xf32>
    %cst_7 = arith.constant dense<0.000000e+00> : vector<8x128xf32>
    %15 = tpu.matmul %13, %14, %cst_7 {dimension_numbers = #tpu.dot_dimension_numbers<[1], [0], [0], [1], [0, 0, 1, 1], [], []>, precision = #tpu.contract_precision<fp32>} : vector<8x40xf32>, vector<40x128xf32>, vector<8x128xf32> -> vector<8x128xf32>
    %c0_8 = arith.constant 0 : index
    %c0_9 = arith.constant 0 : index
    %16 = vector.load %arg4[%c0_8, %c0_9] : memref<8x128xf32, #tpu.memory_space<vmem>>, vector<8x128xf32>
    tpu.vector_store %arg4[%c0_8, %c0_9], %15 {strides = array<i32>} : memref<8x128xf32, #tpu.memory_space<vmem>>, vector<8x128xf32>,
    return
  }
  func.func @transform_0(%arg0: i32) -> (i32, i32) {
    %c0_i32 = arith.constant 0 : i32
    %c0_i32_0 = arith.constant 0 : i32
    return %arg0, %c0_i32 : i32, i32
  }
  func.func @transform_1(%arg0: i32) -> (i32, i32) {
    %c0_i32 = arith.constant 0 : i32
    %c0_i32_0 = arith.constant 0 : i32
    %c0_i32_1 = arith.constant 0 : i32
    return %c0_i32, %c0_i32_0 : i32, i32
  }
  func.func @transform_2(%arg0: i32) -> (i32, i32) {
    %c0_i32 = arith.constant 0 : i32
    %c0_i32_0 = arith.constant 0 : i32
    %c0_i32_1 = arith.constant 0 : i32
    return %c0_i32, %c0_i32_0 : i32, i32
  }
  func.func @transform_3(%arg0: i32) -> (i32, i32) {
    %c0_i32 = arith.constant 0 : i32
    %c0_i32_0 = arith.constant 0 : i32
    return %arg0, %c0_i32 : i32, i32
  }
}

</mosaic_0001>

<bundles_post_ra>
// kernel: tpu_custom_call.1
= control target key start
LH: loop header
LB: loop body
LE: loop exit
PB: predicated region body
PF: predicated region fallthrough
CT: control target
= control target key end

     0   :  { %8 = vsyncpa [#allocation3], 0  ;;  %s1489_s0 = inlined_call_operand.vmem [shape: s32[8,2], index: 0, kind: input, shape index: {}]   ;;  %s1490_s1 = inlined_call_operand.hbm [shape: f32[16,40], index: 1, kind: input, shape index: {}]   ;;  %s1491_s2 = inlined_call_operand.hbm [shape: f32[40,128], index: 2, kind: input, shape index: {}]   ;;  %s1492_s3 = inlined_call_operand.hbm [shape: f32[8,128], index: 3, kind: output, shape index: {}]  }
   0x1   :  { %9 = vsyncpa [#allocation6], 0 }
   0x2   :  { %10 = vsyncpa [#allocation4], 0  ;;  %s1302_s12 = smov [#allocation2]  }
   0x3   :  { %s18_s13 = sshll.u32 %s1302_s12, 4  ;;  %s19_s13 = int_to_ptr.vmem [resolvable:$true] %s18_s13 }
   0x4   :  { %s1244_s14 = scalar_lea.vmem %s19_s13, 256  ;;  %p1249_p1 = scmp.lt.s32.totalorder %s19_s13, %s19_s13 }
   0x5   :  { %p1245_p0 = scmp.ne.s32.totalorder %s19_s13, %s1244_s14  ;;  %p1250_p2 = scmp.lt.s32.totalorder %s1244_s14, %s1244_s14 }
   0x7   :  { %p1251_p3 = por %p1250_p2, %p1249_p1 }
   0x9   :  { %p1252_p4 = pnand %p1251_p3, %p1245_p0 }
   0xb   :  { %1255 = shalt.err (!%p1252_p4)
}
   0xc   :  { %s1303_s15 = smov 128   ;;  %s1304_s16 = smov 8  }
   0xd   :  { %24 = dma.hbm_to_vmem [thread:$0]  %s1490_s1, 256, %s19_s13, [#allocation3], %s1303_s15, %s1303_s15, %s1304_s16  }
   0xe   :  { %s1305_s19 = smov [#allocation5]  }
   0xf   :  { %s30_s20 = sshll.u32 %s1305_s19, 4  ;;  %s31_s20 = int_to_ptr.vmem [resolvable:$true] %s30_s20 }
  0x10   :  { %s1264_s21 = scalar_lea.vmem %s31_s20, 640  ;;  %p1269_p6 = scmp.lt.s32.totalorder %s31_s20, %s31_s20 }
  0x11   :  { %p1265_p5 = scmp.ne.s32.totalorder %s31_s20, %s1264_s21  ;;  %p1270_p7 = scmp.lt.s32.totalorder %s1264_s21, %s1264_s21 }
  0x13   :  { %p1271_p8 = por %p1270_p7, %p1269_p6 }
  0x15   :  { %p1272_p9 = pnand %p1271_p8, %p1265_p5 }
  0x17   :  { %1275 = shalt.err (!%p1272_p9)
}
  0x18   :  { %36 = dma.hbm_to_vmem [thread:$0]  %s1491_s2, 640, %s31_s20, [#allocation6], %s1303_s15, %s1303_s15, %s1304_s16  }
  0x19   :  { %1296 = dma.done.wait [#allocation3], 256  }
  0x1a   :  { %1297 = vsyncadd [#allocation3], 4294967040 }
  0x1b   :  { %1298 = dma.done.wait [#allocation6], 640  }
  0x1c   :  { %1299 = vsyncadd [#allocation6], 4294966656  ;;  %v1306_v0 = vmov 0   ;;  %v1307_v1 = vmov 0.0   ;;  %v43_v2 = vld [vmem:[%s1489_s0] sm:$0xff]  ;;  %v58_v3 = vld [vmem:[#allocation2 + $0x8] sm:$0xff]  ;;  %v44_v16 = vlaneseq }
  0x1d   :  { %1234 = vset.pattern.permute.xlu0 %v1306_v0  ;;  %1112 = vmatprep.subr.mxu1 %v1307_v1  ;;  %v57_v4 = vld [vmem:[#allocation2] sm:$0xff]  ;;  %v92_v5 = vand.u32 4294901760, %v58_v3  ;;  %vm1308_vm0 = vmmov 0   ;;  %v1309_v9 = vmov 1   ;;  %vm59_vm3 = vcmask 130048   ;;  %v527_v26 = vld [vmem:[#allocation5 + $0x20] sm:$0xff] }
  0x1e   :  { %1105 = vmatprep.subr.mxu0 %v1307_v1  ;;  %47 = vperm.xlu0 %1234, %v43_v2   ;;  %v95_v6 = vand.u32 4294901760, %v57_v4  ;;  %v45_v18 = vand.u32 127, %v44_v16  ;;  %v1375_v27 = vand.u32 4294901760, %v527_v26  ;;  %v526_v28 = vld [vmem:[#allocation5 + $0x18] sm:$0xff]  ;;  %v525_v31 = vld [vmem:[#allocation5 + $0x10] sm:$0xff]  ;;  %v524_v35 = vld [vmem:[#allocation5 + $0x8] sm:$0xff] }
  0x1f   :  { %v170_v7 = vsub.f32 %v58_v3, %v92_v5  ;;  %1106 = vmatpush3.msra.mxu0 %v92_v5  ;;  %1116 = vmatprep.mubr.msk.f32.mxu1 %vm1308_vm0, %v1307_v1  ;;  %v1380_v30 = vand.u32 4294901760, %v526_v28  ;;  %v1388_v34 = vand.u32 4294901760, %v525_v31  ;;  %v1399_v39 = vand.u32 4294901760, %v524_v35  ;;  %v523_v40 = vld [vmem:[#allocation5] sm:$0xff]  ;;  %s1310_s0 = smov [#allocation7]  }
  0x20   :  { %v177_v8 = vsub.f32 %v57_v4, %v95_v6  ;;  %1107 = vmatprep.subr.mxu0 %v1307_v1  ;;  %1109 = vmatprep.mubr.msk.f32.mxu0 %vm1308_vm0, %v1307_v1  ;;  %v1378_v29 = vsub.f32 %v527_v26, %v1375_v27  ;;  %v1411_v45 = vand.u32 4294901760, %v523_v40  ;;  %vm528_vm5 = vcmask 326656   ;;  %s1037_s2 = sshll.u32 %s1310_s0, 4  ;;  %s1038_s2 = int_to_ptr.vmem [resolvable:$true] %s1037_s2 }
  0x21   :  { %v171_v10 = vand.u32 4294901760, %v170_v7  ;;  %1108 = vmatpush3.msra.mxu0 %v95_v6  ;;  %v1386_v33 = vsub.f32 %v526_v28, %v1380_v30  ;;  %v1397_v38 = vsub.f32 %v525_v31, %v1388_v34  ;;  %v1408_v44 = vsub.f32 %v524_v35, %v1399_v39  ;;  %s1276_s25 = scalar_lea.vmem %s1038_s2, 128  ;;  %p1281_p11 = scmp.lt.s32.totalorder %s1038_s2, %s1038_s2 }
  0x22   :  { %1235 = vset.pattern.permute.xlu0 %v1309_v9  ;;  %v178_v11 = vand.u32 4294901760, %v177_v8  ;;  %1119 = vmatprep.subr.mxu0 %v1307_v1  ;;  %v637_v32 = vand.u32 4294901760, %v1378_v29  ;;  %v1420_v49 = vsub.f32 %v523_v40, %v1411_v45  ;;  %p1277_p10 = scmp.ne.s32.totalorder %s1038_s2, %s1276_s25  ;;  %p1282_p12 = scmp.lt.s32.totalorder %s1276_s25, %s1276_s25 }
  0x23   :  { %51 = vperm.xlu0 %1235, %v43_v2   ;;  %v172_v12 = vsub.f32 %v170_v7, %v171_v10  ;;  %v644_v37 = vand.u32 4294901760, %v1386_v33  ;;  %v651_v43 = vand.u32 4294901760, %v1397_v38  ;;  %v658_v48 = vand.u32 4294901760, %v1408_v44 }
  0x24   :  { %v179_v13 = vsub.f32 %v177_v8, %v178_v11  ;;  %v638_v36 = vsub.f32 %v1378_v29, %v637_v32  ;;  %v665_v52 = vand.u32 4294901760, %v1420_v49  ;;  %p1283_p13 = por %p1282_p12, %p1281_p11 }
  0x25   :  { %v173_v14 = vand.u32 4294901760, %v172_v12  ;;  %v645_v42 = vsub.f32 %v1386_v33, %v644_v37  ;;  %v652_v47 = vsub.f32 %v1397_v38, %v651_v43  ;;  %v659_v51 = vsub.f32 %v1408_v44, %v658_v48 }
  0x26   :  { %v180_v15 = vand.u32 4294901760, %v179_v13  ;;  %v639_v41 = vand.u32 4294901760, %v638_v36  ;;  %v666_v54 = vsub.f32 %v1420_v49, %v665_v52  ;;  %p1284_p0 = pnand %p1283_p13, %p1277_p10 }
  0x27   :  { %1113 = vmatpush3.msra.mxu1 %v173_v14  ;;  %v646_v46 = vand.u32 4294901760, %v645_v42  ;;  %v653_v50 = vand.u32 4294901760, %v652_v47  ;;  %v660_v53 = vand.u32 4294901760, %v659_v51 }
  0x28   :  { %1114 = vmatprep.subr.mxu1 %v1307_v1  ;;  %v667_v55 = vand.u32 4294901760, %v666_v54 }
  0x29   :  { %1115 = vmatpush3.msra.mxu1 %v180_v15 }
  0x2a   :  { %1126 = vmatprep.subr.mxu1 %v1307_v1 }
  0x99   :  { %v48_v17 = vpop.permute.xlu0 %47 }
  0x9a   :  { %vm49_vm1 = vcmp.eq.s32.totalorder %v45_v18, %v48_v17 }
  0x9e   :  { %v52_v19 = vpop.permute.xlu0 %51 }
  0x9f   :  { %vm53_vm2 = vcmp.eq.s32.totalorder %v45_v18, %v52_v19 }
  0xa0   :  { %vm54_vm4 = vmor %vm49_vm1, %vm53_vm2 }
  0xa1   :  { %v1047_v20 = vsel %vm54_vm4, 1.0, %v1307_v1 }
  0xa2   :  { %v61_v21 = vsel %vm59_vm3, %v1047_v20, 0  ;;  %1117 = vmatmul.mubr.msk.f32.vlgmr.msra.gmra.mxu1 %vm59_vm3, %v1047_v20 }
  0xa3   :  { %v131_v22 = vsub.f32 %v61_v21, %v61_v21  ;;  %1127 = vmatpush3.msra.mxu1 %v92_v5  ;;  %1130 = vmatprep.mubr.msk.f32.mxu1 %vm1308_vm0, %v1307_v1 }
  0xa4   :  { %1128 = vmatprep.subr.mxu1 %v1307_v1 }
  0xa5   :  { %1129 = vmatpush3.msra.mxu1 %v95_v6  ;;  %v132_v23 = vand.u32 4294901760, %v131_v22 }
  0xa6   :  { %1140 = vmatprep.subr.mxu1 %v1307_v1 }
  0xa7   :  { %1131 = vmatmul.mubr.f32.vlgmr.msra.gmra.mxu1 %v132_v23  ;;  %v133_v24 = vsub.f32 %v131_v22, %v132_v23 }
  0xa8   :  { %1141 = vmatpush3.msra.mxu1 %v92_v5  ;;  %1144 = vmatprep.mubr.msk.f32.mxu1 %vm1308_vm0, %v1307_v1 }
  0xa9   :  { %1142 = vmatprep.subr.mxu1 %v1307_v1  ;;  %v134_v25 = vand.u32 4294901760, %v133_v24 }
  0xaa   :  { %1143 = vmatpush3.msra.mxu1 %v95_v6 }
  0xab   :  { %1110 = vmatmul.mubr.f32.vlgmr.msra.gmra.mxu0 %v134_v25  ;;  %1145 = vmatmul.mubr.msk.f32.vlgmr.msra.gmra.mxu1 %vm59_vm3, %v1047_v20 }
  0xac   :  { %1120 = vmatpush3.msra.mxu0 %v170_v7  ;;  %1123 = vmatprep.mubr.msk.f32.mxu0 %vm1308_vm0, %v1307_v1 }
  0xad   :  { %1121 = vmatprep.subr.mxu0 %v1307_v1  ;;  %1160 = vmatprep.subr.mxu1 %v1307_v1 }
  0xae   :  { %1122 = vmatpush3.msra.mxu0 %v177_v8  ;;  %1170 = vmatprep.mubr.msk.f32.mxu1 %vm1308_vm0, %v1307_v1 }
  0xaf   :  { %1133 = vmatprep.subr.mxu0 %v1307_v1  ;;  %1124 = vmatmul.mubr.f32.vlgmr.msra.gmra.mxu0 %v131_v22 }
  0xb0   :  { %1134 = vmatpush3.msra.mxu0 %v171_v10  ;;  %1137 = vmatprep.mubr.msk.f32.mxu0 %vm1308_vm0, %v1307_v1 }
  0xb1   :  { %1135 = vmatprep.subr.mxu0 %v1307_v1  ;;  %1161 = vmatpush3.msra.mxu1 %v639_v41 }
  0xb2   :  { %1136 = vmatpush3.msra.mxu0 %v178_v11  ;;  %1162 = vmatprep.subr.mxu1 %v1307_v1 }
  0xb3   :  { %1138 = vmatmul.mubr.msk.f32.vlgmr.msra.gmra.mxu0 %vm59_vm3, %v1047_v20  ;;  %1147 = vmatprep.subr.mxu0 %v1307_v1 }
  0xb4   :  { %1157 = vmatprep.mubr.msk.f32.mxu0 %vm1308_vm0, %v1307_v1  ;;  %1148 = vmatpush3.msra.mxu0 %v1375_v27 }
  0xb5   :  { %1149 = vmatprep.subr.mxu0 %v1307_v1  ;;  %1163 = vmatpush3.msra.mxu1 %v646_v46 }
  0xb6   :  { %1150 = vmatpush3.msra.mxu0 %v1380_v30  ;;  %1164 = vmatprep.subr.mxu1 %v1307_v1 }
  0xb7   :  { %1151 = vmatprep.subr.mxu0 %v1307_v1  ;;  %1165 = vmatpush3.msra.mxu1 %v653_v50 }
  0xb8   :  { %1152 = vmatpush3.msra.mxu0 %v1388_v34  ;;  %1166 = vmatprep.subr.mxu1 %v1307_v1 }
  0xb9   :  { %1153 = vmatprep.subr.mxu0 %v1307_v1  ;;  %1167 = vmatpush3.msra.mxu1 %v660_v53 }
  0xba   :  { %1154 = vmatpush3.msra.mxu0 %v1399_v39  ;;  %1168 = vmatprep.subr.mxu1 %v1307_v1 }
  0xbb   :  { %1155 = vmatprep.subr.mxu0 %v1307_v1  ;;  %1169 = vmatpush3.msra.mxu1 %v667_v55 }
  0xbc   :  { %1156 = vmatpush3.msra.mxu0 %v1411_v45  ;;  %1186 = vmatprep.subr.mxu1 %v1307_v1 }
  0xbd   :  { %1173 = vmatprep.subr.mxu0 %v1307_v1 }
 0x162   :  { %v217_v56 = vpop.f32.mrf.mxu1 }
 0x164   :  { %v1118_v57 = vpop.f32.mrf.mxu1 }
 0x167   :  { %v368_v58 = vpop.f32.mrf.mxu1 }
 0x169   :  { %v1132_v59 = vpop.f32.mrf.mxu1 }
 0x16b   :  { %v136_v60 = vpop.f32.mrf.mxu0  ;;  %v518_v61 = vpop.f32.mrf.mxu1 }
 0x16c   :  { %v218_v0 = vadd.f32 %v217_v56, %v136_v60 }
 0x16d   :  { %v1111_v62 = vpop.f32.mrf.mxu0  ;;  %v1146_v63 = vpop.f32.mrf.mxu1 }
 0x16f   :  { %v293_v2 = vpop.f32.mrf.mxu0 }
 0x170   :  { %v294_v3 = vadd.f32 %v293_v2, %v218_v0 }
 0x171   :  { %v1125_v4 = vpop.f32.mrf.mxu0 }
 0x172   :  { %v369_v5 = vadd.f32 %v368_v58, %v294_v3 }
 0x173   :  { %v445_v6 = vpop.f32.mrf.mxu0 }
 0x174   :  { %v446_v7 = vadd.f32 %v445_v6, %v369_v5 }
 0x175   :  { %v1139_v8 = vpop.f32.mrf.mxu0 }
 0x176   :  { %v519_v9 = vadd.f32 %v518_v61, %v446_v7 }
 0x178   :  { %v522_v10 = vmax.f32 %v519_v9, 0.0 }
 0x17a   :  { %v530_v11 = vsel %vm528_vm5, %v522_v10, 0 }
 0x17b   :  { %v602_v12 = vand.u32 4294901760, %v530_v11 }
 0x17d   :  { %v603_v13 = vsub.f32 %v530_v11, %v602_v12  ;;  %1171 = vmatmul.mubr.f32.vlgmr.msra.gmra.mxu1 %v602_v12 }
 0x17e   :  { %1187 = vmatpush3.msra.mxu1 %v1375_v27  ;;  %1196 = vmatprep.mubr.msk.f32.mxu1 %vm1308_vm0, %v1307_v1 }
 0x17f   :  { %1188 = vmatprep.subr.mxu1 %v1307_v1  ;;  %v604_v14 = vand.u32 4294901760, %v603_v13 }
 0x180   :  { %1189 = vmatpush3.msra.mxu1 %v1380_v30 }
 0x181   :  { %1190 = vmatprep.subr.mxu1 %v1307_v1  ;;  %v605_v15 = vsub.f32 %v603_v13, %v604_v14 }
 0x182   :  { %1191 = vmatpush3.msra.mxu1 %v1388_v34 }
 0x183   :  { %1192 = vmatprep.subr.mxu1 %v1307_v1  ;;  %v606_v16 = vand.u32 4294901760, %v605_v15 }
 0x184   :  { %1193 = vmatpush3.msra.mxu1 %v1399_v39 }
 0x185   :  { %1194 = vmatprep.subr.mxu1 %v1307_v1  ;;  %1158 = vmatmul.mubr.f32.vlgmr.msra.gmra.mxu0 %v606_v16 }
 0x186   :  { %1174 = vmatpush3.msra.mxu0 %v1378_v29  ;;  %1195 = vmatpush3.msra.mxu1 %v1411_v45 }
 0x187   :  { %1175 = vmatprep.subr.mxu0 %v1307_v1  ;;  %1197 = vmatmul.mubr.f32.vlgmr.msra.gmra.mxu1 %v604_v14 }
 0x188   :  { %1212 = vmatprep.subr.mxu1 %v1307_v1  ;;  %1176 = vmatpush3.msra.mxu0 %v1386_v33 }
 0x189   :  { %1213 = vmatpush3.msra.mxu1 %v1375_v27  ;;  %1177 = vmatprep.subr.mxu0 %v1307_v1 }
 0x18a   :  { %1214 = vmatprep.subr.mxu1 %v1307_v1  ;;  %1178 = vmatpush3.msra.mxu0 %v1397_v38 }
 0x18b   :  { %1215 = vmatpush3.msra.mxu1 %v1380_v30  ;;  %1179 = vmatprep.subr.mxu0 %v1307_v1 }
 0x18c   :  { %1216 = vmatprep.subr.mxu1 %v1307_v1  ;;  %1180 = vmatpush3.msra.mxu0 %v1408_v44 }
 0x18d   :  { %1217 = vmatpush3.msra.mxu1 %v1388_v34  ;;  %1181 = vmatprep.subr.mxu0 %v1307_v1 }
 0x18e   :  { %1218 = vmatprep.subr.mxu1 %v1307_v1  ;;  %1182 = vmatpush3.msra.mxu0 %v1420_v49 }
 0x18f   :  { %1183 = vmatprep.mubr.msk.f32.mxu0 %vm1308_vm0, %v1307_v1  ;;  %1219 = vmatpush3.msra.mxu1 %v1399_v39 }
 0x190   :  { %1184 = vmatmul.mubr.f32.vlgmr.msra.gmra.mxu0 %v603_v13  ;;  %1199 = vmatprep.subr.mxu0 %v1307_v1 }
 0x191   :  { %1220 = vmatprep.subr.mxu1 %v1307_v1  ;;  %1200 = vmatpush3.msra.mxu0 %v637_v32 }
 0x192   :  { %1221 = vmatpush3.msra.mxu1 %v1411_v45  ;;  %1222 = vmatprep.mubr.msk.f32.mxu1 %vm1308_vm0, %v1307_v1 }
 0x193   :  { %1201 = vmatprep.subr.mxu0 %v1307_v1  ;;  %1223 = vmatmul.mubr.f32.vlgmr.msra.gmra.mxu1 %v602_v12 }
 0x194   :  { %1202 = vmatpush3.msra.mxu0 %v644_v37  ;;  %1209 = vmatprep.mubr.msk.f32.mxu0 %vm1308_vm0, %v1307_v1 }
 0x195   :  { %1203 = vmatprep.subr.mxu0 %v1307_v1 }
 0x196   :  { %1204 = vmatpush3.msra.mxu0 %v651_v43 }
 0x197   :  { %1205 = vmatprep.subr.mxu0 %v1307_v1 }
 0x198   :  { %1206 = vmatpush3.msra.mxu0 %v658_v48 }
 0x199   :  { %1207 = vmatprep.subr.mxu0 %v1307_v1 }
 0x19a   :  { %1208 = vmatpush3.msra.mxu0 %v665_v52 }
 0x19b   :  { %1210 = vmatmul.mubr.f32.vlgmr.msra.gmra.mxu0 %v602_v12 }
 0x23d   :  { %v704_v17 = vpop.f32.mrf.mxu1 }
 0x23f   :  { %v1172_v18 = vpop.f32.mrf.mxu1 }
 0x245   :  { %v608_v19 = vpop.f32.mrf.mxu0 }
 0x246   :  { %v705_v26 = vadd.f32 %v704_v17, %v608_v19 }
 0x247   :  { %v864_v20 = vpop.f32.mrf.mxu1  ;;  %v1159_v21 = vpop.f32.mrf.mxu0 }
 0x249   :  { %v1198_v22 = vpop.f32.mrf.mxu1 }
 0x250   :  { %v786_v23 = vpop.f32.mrf.mxu0 }
 0x251   :  { %v787_v28 = vadd.f32 %v786_v23, %v705_v26 }
 0x252   :  { %v1185_v24 = vpop.f32.mrf.mxu0 }
 0x253   :  { %v1026_v25 = vpop.f32.mrf.mxu1  ;;  %v865_v29 = vadd.f32 %v864_v20, %v787_v28 }
 0x255   :  { %v1224_v27 = vpop.f32.mrf.mxu1 }
 0x25b   :  { %v950_v30 = vpop.f32.mrf.mxu0 }
 0x25c   :  { %v951_v1 = vadd.f32 %v950_v30, %v865_v29 }
 0x25d   :  { %v1211_v31 = vpop.f32.mrf.mxu0 }
 0x25e   :  { %v1027_v32 = vadd.f32 %v1026_v25, %v951_v1 }
 0x260   :  { %1030 = vst [vmem:[#allocation7] sm:$0xff] %v1027_v32 }
 0x261   :  { %1287 = shalt.err (!%p1284_p0)
}
 0x262   :  { %1040 = dma.vmem_to_hbm [thread:$0]  %s1038_s2, 128, %s1492_s3, [#allocation4]  }
 0x263   :  { %1300 = dma.done.wait [#allocation4], 128  }
 0x264   :  { %1301 = vsyncadd [#allocation4], 4294967168 }
 0x265   :  { %1044 = vsyncpa [#allocation3], 1 }
 0x266   :  { %1045 = vsyncpa [#allocation6], 1 }
 0x267   :  { %1046 = vsyncpa [#allocation4], 1 }

</bundles_post_ra>
